<compile_context>
chip_gen: v7x
topology: tpu7x:2x2x1
jax: 0.10.0
libtpu: 0.0.40
codegen_flags: <defaults>
</compile_context>

<pallas_src>
import math
from functools import lru_cache

import numpy as np
import jax
import jax.numpy as jnp
from jax.experimental import pallas as pl
from jax.experimental.pallas import tpu as pltpu

PHI = (1.0 + math.sqrt(5.0)) / 2.0
_COS_ALPHA = math.cos(PHI * math.pi / 3.0)        # ~ -0.123, threshold constant
_C2 = _COS_ALPHA * _COS_ALPHA
_HIGHEST = jax.lax.Precision.HIGHEST


@lru_cache(maxsize=8)
def _dft_matrices(n):
    """bf16 cos / -sin matrices for an n-point DFT along dim 0 (host-cached)."""
    k = np.arange(n, dtype=np.float64)
    ang = 2.0 * np.pi * np.outer(k, k) / float(n)
    cos_m = jnp.asarray(np.cos(ang), dtype=jnp.bfloat16)
    nsin_m = jnp.asarray(-np.sin(ang), dtype=jnp.bfloat16)
    return cos_m, nsin_m


def _row_tile(n, target):
    """Largest row-block <= target that divides n (multiple of 8), else n."""
    if n <= target:
        return n
    for c in (target, 256, 128, 64, 32, 16, 8):
        if c <= target and n % c == 0:
            return c
    return n


def _hebbian_flux_train_kernel(x_ref, w_ref, cos_ref, nsin_ref, o_ref,
                               y_f32_ref, y_bf16_ref):
    i = pl.program_id(1)            # DFT / output row-block (inner, "arbitrary")
    tm = o_ref.shape[0]

    @pl.when(i == 0)
    def _():
        # Small matmul: keep f32 HIGHEST (y is the output value), once per tile.
        y = jnp.tanh(jnp.dot(x_ref[...], w_ref[...],
                             preferred_element_type=jnp.float32,
                             precision=_HIGHEST))
        y_f32_ref[...] = y
        y_bf16_ref[...] = y.astype(jnp.bfloat16)

    # Dominant work: [tm, N] @ [N, tn] DFT row-block matmuls, single-pass bf16
    # on the MXU with f32 accumulation (result only feeds a threshold).
    yb = y_bf16_ref[...]
    re = jnp.dot(cos_ref[...], yb, preferred_element_type=jnp.float32)
    im = jnp.dot(nsin_ref[...], yb, preferred_element_type=jnp.float32)

    # cos(angle/phi) > 0.5 without atan2 / sqrt (see header comment).
    keep = jnp.logical_or(re >= 0.0,
                          (1.0 - _C2) * (re * re) < _C2 * (im * im))

    start = pl.multiple_of(i * tm, tm)
    y_blk = y_f32_ref[pl.ds(start, tm), :]
    o_ref[...] = jnp.where(keep, y_blk, 0.0)


def _hebbian_flux_eval_kernel(x_ref, w_ref, o_ref):
    o_ref[...] = jnp.tanh(jnp.dot(x_ref[...], w_ref[...],
                                  preferred_element_type=jnp.float32,
                                  precision=_HIGHEST))


def hebbian_flux_forward(x, W, *, training=True):
    """Pallas TPU implementation of HebbianFluxLayer.forward."""
    x = jnp.asarray(x, jnp.float32)
    W = jnp.asarray(W, jnp.float32)
    N, in_dim = x.shape
    in_dim_w, out_dim = W.shape
    assert in_dim == in_dim_w

    # Lane-dense output: pad out_dim up to a multiple of 128 (sliced off below).
    out_pad = max(128, -(-out_dim // 128) * 128)
    # 256-wide tiles fill the 256-wide v6e/v7x MXU; 128 otherwise (fine on v5e).
    tn = 256 if out_pad % 256 == 0 else 128
    W_k = W if out_pad == out_dim else jnp.pad(W, ((0, 0), (0, out_pad - out_dim)))

    if training:
        cos_m, nsin_m = _dft_matrices(N)
        tm = _row_tile(N, 256)                      # DFT / output row-block
        grid = (out_pad // tn, N // tm)             # (parallel out-tiles, arbitrary rows)

        est = (2 * N * in_dim * 4                   # x (double-buffered, fetched once)
               + 2 * in_dim * tn * 4                # W tile
               + 2 * 2 * tm * N * 2                 # bf16 cos/-sin row-blocks, dbl-buffered
               + N * tn * (4 + 2)                   # y scratches (f32 + bf16)
               + 2 * tm * tn * 4)                   # output tile
        vmem_limit = int(min(max(2 * est + (4 << 20), 32 << 20), 128 << 20))

        out = pl.pallas_call(
            _hebbian_flux_train_kernel,
            out_shape=jax.ShapeDtypeStruct((N, out_pad), jnp.float32),
            grid=grid,
            in_specs=[
                pl.BlockSpec((N, in_dim), lambda j, i: (0, 0)),    # x: whole, reused
                pl.BlockSpec((in_dim, tn), lambda j, i: (0, j)),   # W out-feature tile
                pl.BlockSpec((tm, N), lambda j, i: (i, 0)),        # DFT cos row-block
                pl.BlockSpec((tm, N), lambda j, i: (i, 0)),        # DFT -sin row-block
            ],
            out_specs=pl.BlockSpec((tm, tn), lambda j, i: (i, j)),
            scratch_shapes=[
                pltpu.VMEM((N, tn), jnp.float32),    # y  (output values)
                pltpu.VMEM((N, tn), jnp.bfloat16),   # y  (MXU DFT input)
            ],
            compiler_params=pltpu.CompilerParams(
                dimension_semantics=("parallel", "arbitrary"),
                vmem_limit_bytes=vmem_limit),
        )(x, W_k, cos_m, nsin_m)
    else:
        tm = _row_tile(N, 512)                      # tile N too: pipelining + megacore
        grid = (N // tm, out_pad // tn)
        est = (2 * tm * in_dim * 4 + 2 * in_dim * tn * 4 + 2 * tm * tn * 4)
        vmem_limit = int(min(max(2 * est + (4 << 20), 32 << 20), 128 << 20))

        out = pl.pallas_call(
            _hebbian_flux_eval_kernel,
            out_shape=jax.ShapeDtypeStruct((N, out_pad), jnp.float32),
            grid=grid,
            in_specs=[
                pl.BlockSpec((tm, in_dim), lambda i, j: (i, 0)),
                pl.BlockSpec((in_dim, tn), lambda i, j: (0, j)),
            ],
            out_specs=pl.BlockSpec((tm, tn), lambda i, j: (i, j)),
            compiler_params=pltpu.CompilerParams(
                dimension_semantics=("parallel", "parallel"),
                vmem_limit_bytes=vmem_limit),
        )(x, W_k)

    return out[:, :out_dim] if out_pad != out_dim else out


if __name__ == "__main__":
    # small shapes consistent with the module: N (batch/seq) x in_dim -> out_dim
    N, in_dim, out_dim = 8, 16, 32

    key = jax.random.PRNGKey(0)
    kx, kw = jax.random.split(key)
    x = jax.random.normal(kx, (N, in_dim), dtype=jnp.float32)
    W = jax.random.normal(kw, (in_dim, out_dim), dtype=jnp.float32) * 0.1

    # training-mode forward (nn.Module default is training=True)
    out_train = jax.block_until_ready(hebbian_flux_forward(x, W, training=True))

    # pure-JAX reference mirroring the torch forward
    y_ref = jnp.tanh(jnp.dot(x, W, precision=jax.lax.Precision.HIGHEST))
    fz = jnp.fft.fft(y_ref, axis=0)
    coherence = jnp.cos(jnp.angle(fz) / PHI)
    ref_train = y_ref * (coherence > 0.5).astype(jnp.float32)

    assert out_train.shape == (N, out_dim) and out_train.dtype == jnp.float32

    # The kernel computes the DFT in bf16; elements whose decision quantity
    # (re - c*|z|) sits near 0 may legitimately flip the 0/1 mask.  Outside
    # that narrow band the kernel must match the reference; inside it the
    # output must still be either y or 0.
    decision = fz.real - _COS_ALPHA * jnp.abs(fz)
    ambiguous = jnp.abs(decision) < 0.1
    tol = 2e-3
    strict_ok = jnp.where(ambiguous, True, jnp.abs(out_train - ref_train) <= tol)
    amb_ok = jnp.where(
        ambiguous,
        (jnp.abs(out_train - y_ref) <= tol) | (jnp.abs(out_train) <= tol),
        True)
    assert bool(jnp.all(strict_ok)), "training output mismatch outside ambiguity band"
    assert bool(jnp.all(amb_ok)), "training output mismatch inside ambiguity band"

    # eval-mode forward (no Hebbian sparsity mask)
    out_eval = jax.block_until_ready(hebbian_flux_forward(x, W, training=False))
    assert out_eval.shape == (N, out_dim)
    assert jnp.allclose(out_eval, y_ref, rtol=1e-3, atol=1e-3), (
        float(jnp.max(jnp.abs(out_eval - y_ref))))

    print("KERNEL_OK")
</pallas_src>

<mosaic_0001>
module attributes {stable_mosaic.version = 11 : i64} {
  func.func @_hebbian_flux_train_kernel(%arg0: i32, %arg1: i32, %arg2: memref<8x16xf32, #tpu.memory_space<vmem>>, %arg3: memref<16x128xf32, #tpu.memory_space<vmem>>, %arg4: memref<8x8xbf16, #tpu.memory_space<vmem>>, %arg5: memref<8x8xbf16, #tpu.memory_space<vmem>>, %arg6: memref<8x128xf32, #tpu.memory_space<vmem>>, %arg7: memref<8x128xf32, #tpu.memory_space<vmem>>, %arg8: memref<8x128xbf16, #tpu.memory_space<vmem>>) attributes {dimension_semantics = [#tpu.dimension_semantics<parallel>, #tpu.dimension_semantics<arbitrary>], iteration_bounds = array<i64: 1, 1>, scalar_prefetch = 0 : i64, scratch_operands = 2 : i64, tpu.core_type = #tpu.core_type<tc>, window_params = [{pipeline_mode = #tpu.pipeline_mode<synchronous>, transform_indices = @transform_0, window_bounds = array<i64: 8, 16>}, {transform_indices = @transform_1, window_bounds = array<i64: 16, 128>}, {transform_indices = @transform_2, window_bounds = array<i64: 8, 8>}, {transform_indices = @transform_3, window_bounds = array<i64: 8, 8>}, {transform_indices = @transform_4, window_bounds = array<i64: 8, 128>}]} {
    %c0_i32 = arith.constant 0 : i32
    %0 = arith.cmpi eq, %arg1, %c0_i32 : i32
    %1 = arith.extui %0 : i1 to i32
    %c0_i32_0 = arith.constant 0 : i32
    %2 = arith.cmpi ne, %1, %c0_i32_0 : i32
    scf.if %2 {
      %c0_14 = arith.constant 0 : index
      %c0_15 = arith.constant 0 : index
      %25 = vector.load %arg2[%c0_14, %c0_15] : memref<8x16xf32, #tpu.memory_space<vmem>>, vector<8x16xf32>
      %c0_16 = arith.constant 0 : index
      %c0_17 = arith.constant 0 : index
      %26 = vector.load %arg3[%c0_16, %c0_17] : memref<16x128xf32, #tpu.memory_space<vmem>>, vector<16x128xf32>
      %cst_18 = arith.constant dense<0.000000e+00> : vector<8x128xf32>
      %27 = tpu.matmul %25, %26, %cst_18 {dimension_numbers = #tpu.dot_dimension_numbers<[1], [0], [0], [1], [0, 0, 1, 1], [], []>, precision = #tpu.contract_precision<fp32>} : vector<8x16xf32>, vector<16x128xf32>, vector<8x128xf32> -> vector<8x128xf32>
      %28 = math.tanh %27 : vector<8x128xf32>
      %c0_19 = arith.constant 0 : index
      %c0_20 = arith.constant 0 : index
      %29 = vector.load %arg7[%c0_19, %c0_20] : memref<8x128xf32, #tpu.memory_space<vmem>>, vector<8x128xf32>
      tpu.vector_store %arg7[%c0_19, %c0_20], %28 {strides = array<i32>} : memref<8x128xf32, #tpu.memory_space<vmem>>, vector<8x128xf32>,
      %30 = arith.truncf %28 : vector<8x128xf32> to vector<8x128xbf16>
      %c0_21 = arith.constant 0 : index
      %c0_22 = arith.constant 0 : index
      %31 = vector.load %arg8[%c0_21, %c0_22] : memref<8x128xbf16, #tpu.memory_space<vmem>>, vector<8x128xbf16>
      tpu.vector_store %arg8[%c0_21, %c0_22], %30 {strides = array<i32>} : memref<8x128xbf16, #tpu.memory_space<vmem>>, vector<8x128xbf16>,
    } else {
    }
    %c0 = arith.constant 0 : index
    %c0_1 = arith.constant 0 : index
    %3 = vector.load %arg8[%c0, %c0_1] : memref<8x128xbf16, #tpu.memory_space<vmem>>, vector<8x128xbf16>
    %c0_2 = arith.constant 0 : index
    %c0_3 = arith.constant 0 : index
    %4 = vector.load %arg4[%c0_2, %c0_3] : memref<8x8xbf16, #tpu.memory_space<vmem>>, vector<8x8xbf16>
    %cst = arith.constant dense<0.000000e+00> : vector<8x128xf32>
    %5 = tpu.matmul %4, %3, %cst {dimension_numbers = #tpu.dot_dimension_numbers<[1], [0], [0], [1], [0, 0, 1, 1], [], []>} : vector<8x8xbf16>, vector<8x128xbf16>, vector<8x128xf32> -> vector<8x128xf32>
    %c0_4 = arith.constant 0 : index
    %c0_5 = arith.constant 0 : index
    %6 = vector.load %arg5[%c0_4, %c0_5] : memref<8x8xbf16, #tpu.memory_space<vmem>>, vector<8x8xbf16>
    %cst_6 = arith.constant dense<0.000000e+00> : vector<8x128xf32>
    %7 = tpu.matmul %6, %3, %cst_6 {dimension_numbers = #tpu.dot_dimension_numbers<[1], [0], [0], [1], [0, 0, 1, 1], [], []>} : vector<8x8xbf16>, vector<8x128xbf16>, vector<8x128xf32> -> vector<8x128xf32>
    %cst_7 = arith.constant 0.000000e+00 : f32
    %8 = vector.broadcast %cst_7 : f32 to vector<8x128xf32>
    %9 = arith.cmpf oge, %5, %8 : vector<8x128xf32>
    %10 = arith.mulf %5, %5 : vector<8x128xf32>
    %cst_8 = arith.constant 0.984799504 : f32
    %11 = vector.broadcast %cst_8 : f32 to vector<8x128xf32>
    %12 = arith.mulf %11, %10 : vector<8x128xf32>
    %13 = arith.mulf %7, %7 : vector<8x128xf32>
    %cst_9 = arith.constant 0.0152005227 : f32
    %14 = vector.broadcast %cst_9 : f32 to vector<8x128xf32>
    %15 = arith.mulf %14, %13 : vector<8x128xf32>
    %16 = arith.cmpf olt, %12, %15 : vector<8x128xf32>
    %17 = arith.ori %9, %16 : vector<8x128xi1>
    %c8_i32 = arith.constant 8 : i32
    %18 = arith.muli %arg1, %c8_i32 : i32
    %19 = tpu.assume_multiple %18, 8 : i32
    %20 = arith.index_cast %19 : i32 to index
    %c0_10 = arith.constant 0 : index
    %21 = vector.load %arg7[%20, %c0_10] : memref<8x128xf32, #tpu.memory_space<vmem>>, vector<8x128xf32>
    %cst_11 = arith.constant 0.000000e+00 : f32
    %22 = vector.broadcast %cst_11 : f32 to vector<8x128xf32>
    %23 = arith.select %17, %21, %22 : vector<8x128xi1>, vector<8x128xf32>
    %c0_12 = arith.constant 0 : index
    %c0_13 = arith.constant 0 : index
    %24 = vector.load %arg6[%c0_12, %c0_13] : memref<8x128xf32, #tpu.memory_space<vmem>>, vector<8x128xf32>
    tpu.vector_store %arg6[%c0_12, %c0_13], %23 {strides = array<i32>} : memref<8x128xf32, #tpu.memory_space<vmem>>, vector<8x128xf32>,
    return
  }
  func.func @transform_0(%arg0: i32, %arg1: i32) -> (i32, i32) {
    %c0_i32 = arith.constant 0 : i32
    %c0_i32_0 = arith.constant 0 : i32
    %c0_i32_1 = arith.constant 0 : i32
    return %c0_i32, %c0_i32_0 : i32, i32
  }
  func.func @transform_1(%arg0: i32, %arg1: i32) -> (i32, i32) {
    %c0_i32 = arith.constant 0 : i32
    %c0_i32_0 = arith.constant 0 : i32
    return %c0_i32, %arg0 : i32, i32
  }
  func.func @transform_2(%arg0: i32, %arg1: i32) -> (i32, i32) {
    %c0_i32 = arith.constant 0 : i32
    %c0_i32_0 = arith.constant 0 : i32
    return %arg1, %c0_i32 : i32, i32
  }
  func.func @transform_3(%arg0: i32, %arg1: i32) -> (i32, i32) {
    %c0_i32 = arith.constant 0 : i32
    %c0_i32_0 = arith.constant 0 : i32
    return %arg1, %c0_i32 : i32, i32
  }
  func.func @transform_4(%arg0: i32, %arg1: i32) -> (i32, i32) {
    %c0_i32 = arith.constant 0 : i32
    return %arg1, %arg0 : i32, i32
  }
}

</mosaic_0001>

<bundles_post_ra>
// kernel: tpu_custom_call.1
= control target key start
LH: loop header
LB: loop body
LE: loop exit
PB: predicated region body
PF: predicated region fallthrough
CT: control target
= control target key end

     0   :  { %9 = vsyncpa [#allocation5], 0  ;;  %s928_s0 = inlined_call_operand.hbm [shape: f32[8,16], index: 0, kind: input, shape index: {}]   ;;  %s929_s1 = inlined_call_operand.hbm [shape: f32[16,128], index: 1, kind: input, shape index: {}]   ;;  %s930_s2 = inlined_call_operand.vmem [shape: bf16[8,8], index: 2, kind: input, shape index: {}]   ;;  %s931_s3 = inlined_call_operand.vmem [shape: bf16[8,8], index: 3, kind: input, shape index: {}]   ;;  %s932_s4 = inlined_call_operand.hbm [shape: f32[8,128], index: 4, kind: output, shape index: {}]  }
   0x1   :  { %10 = vsyncpa [#allocation8], 0 }
   0x2   :  { %11 = vsyncpa [#allocation6], 0  ;;  %s828_s15 = smov [#allocation4]   ;;  %s829_s17 = smov [#allocation7]  }
   0x3   :  { %s18_s16 = sshll.u32 %s828_s15, 4  ;;  %s27_s18 = sshll.u32 %s829_s17, 4  ;;  %s19_s16 = int_to_ptr.vmem [resolvable:$true] %s18_s16  ;;  %s861_s18 = int_to_ptr.vmem [resolvable:$true] %s27_s18 }
   0x4   :  { %s756_s21 = scalar_lea.hbm %s928_s0, 128 }
   0x5   :  { %p757_p0 = scmp.ne.s32.totalorder %s928_s0, %s756_s21  ;;  %p760_p1 = scmp.lt.u32.totalorder %s756_s21, %s928_s0 }
   0x7   :  { %p762_p2 = pnand %p760_p1, %p757_p0 }
   0x9   :  { %765 = shalt.err (!%p762_p2)
}
   0xa   :  { %s766_s26 = scalar_lea.vmem %s19_s16, 128  ;;  %p771_p4 = scmp.lt.s32.totalorder %s19_s16, %s19_s16 }
   0xb   :  { %p767_p3 = scmp.ne.s32.totalorder %s19_s16, %s766_s26  ;;  %p772_p5 = scmp.lt.s32.totalorder %s766_s26, %s766_s26 }
   0xd   :  { %p773_p6 = por %p772_p5, %p771_p4 }
   0xf   :  { %p774_p7 = pnand %p773_p6, %p767_p3 }
  0x11   :  { %777 = shalt.err (!%p774_p7)
}
  0x12   :  { %21 = dma.hbm_to_vmem [thread:$0]  %s928_s0, 128, %s19_s16, [#allocation5]  }
  0x13   :  { %s778_s5 = scalar_lea.hbm %s929_s1, 256 }
  0x14   :  { %p779_p8 = scmp.ne.s32.totalorder %s929_s1, %s778_s5  ;;  %p782_p9 = scmp.lt.u32.totalorder %s778_s5, %s929_s1 }
  0x16   :  { %p784_p10 = pnand %p782_p9, %p779_p8 }
  0x18   :  { %787 = shalt.err (!%p784_p10)
}
  0x19   :  { %s788_s10 = scalar_lea.vmem %s861_s18, 256  ;;  %p793_p12 = scmp.lt.s32.totalorder %s861_s18, %s861_s18 }
  0x1a   :  { %p789_p11 = scmp.ne.s32.totalorder %s861_s18, %s788_s10  ;;  %p794_p13 = scmp.lt.s32.totalorder %s788_s10, %s788_s10 }
  0x1c   :  { %p795_p0 = por %p794_p13, %p793_p12 }
  0x1e   :  { %p796_p1 = pnand %p795_p0, %p789_p11 }
  0x20   :  { %799 = shalt.err (!%p796_p1)
}
  0x21   :  { %s830_s0 = smov 128   ;;  %s831_s11 = smov 8  }
  0x22   :  { %33 = dma.hbm_to_vmem [thread:$0]  %s929_s1, 256, %s861_s18, [#allocation8], %s830_s0, %s830_s0, %s831_s11  }
  0x23   :  { %822 = dma.done.wait [#allocation5], 128  }
  0x24   :  { %823 = vsyncadd [#allocation5], 4294967168 }
  0x25   :  { %824 = dma.done.wait [#allocation8], 256  }
  0x26   :  { %825 = vsyncadd [#allocation8], 4294967040  ;;  %v832_v0 = vmov 0.0|0.0   ;;  %vm833_vm0 = vmmov 0   ;;  %v834_v1 = vmov 0.0   ;;  %vm52_vm1 = vcmask 130048  }
  0x27   :  { %722 = vmatprep.subr.bf16.mxu0 %v832_v0  ;;  %676 = vmatprep.mubr.msk.f32.mxu0 %vm833_vm0, %v834_v1  ;;  %v50_v2 = vld [vmem:[#allocation7] sm:$0xff]  ;;  %v51_v3 = vld [vmem:[#allocation7 + $0x8] sm:$0xff]  ;;  %v49_v4 = vld [vmem:[#allocation4] sm:$0xff]  ;;  %vm525_vm2 = vcmask 1043456   ;;  %vm521_vm3 = vcmask 64512  }
  0x28   :  { %719 = vmatprep.subr.bf16.mxu1 %v832_v0  ;;  %669 = vmatprep.mubr.msk.f32.mxu1 %vm833_vm0, %v834_v1  ;;  %v57_v5 = vand.u32 4294901760, %v50_v2  ;;  %v60_v6 = vand.u32 4294901760, %v51_v3  ;;  %v54_v7 = vsel %vm52_vm1, %v49_v4, 0  ;;  %v520_v34 = vld [vmem:[%s930_s2] sm:$0xf]  ;;  %s835_s2 = smov [#allocation9]  }
  0x29   :  { %v123_v8 = vand.u32 4294901760, %v54_v7  ;;  %v569_v35 = vld [vmem:[%s931_s3] sm:$0xf]  ;;  %s631_s17 = sshll.u32 %s835_s2, 4  ;;  %s632_s17 = int_to_ptr.vmem [resolvable:$true] %s631_s17 }
  0x2a   :  { %v135_v9 = vsub.f32 %v50_v2, %v57_v5  ;;  %v142_v10 = vsub.f32 %v51_v3, %v60_v6  ;;  %v720_v11 = vpack.c.bf16 %v60_v6, %v57_v5  ;;  %s800_s3 = scalar_lea.vmem %s632_s17, 128  ;;  %p805_p3 = scmp.lt.s32.totalorder %s632_s17, %s632_s17 }
  0x2b   :  { %v124_v12 = vsub.f32 %v54_v7, %v123_v8  ;;  %p801_p2 = scmp.ne.s32.totalorder %s632_s17, %s800_s3  ;;  %p806_p4 = scmp.lt.s32.totalorder %s800_s3, %s800_s3 }
  0x2c   :  { %v136_v13 = vand.u32 4294901760, %v135_v9  ;;  %v143_v14 = vand.u32 4294901760, %v142_v10  ;;  %721 = vmatpush3.bf16.msra.mxu1 %v720_v11  ;;  %v726_v23 = vpack.c.bf16 %v142_v10, %v135_v9 }
  0x2d   :  { %v125_v15 = vand.u32 4294901760, %v124_v12  ;;  %707 = vmatprep.subr.bf16.mxu1 %v834_v1  ;;  %p807_p5 = por %p806_p4, %p805_p3 }
  0x2e   :  { %v137_v16 = vsub.f32 %v135_v9, %v136_v13  ;;  %v144_v17 = vsub.f32 %v142_v10, %v143_v14  ;;  %v732_v24 = vpack.c.bf16 %v143_v14, %v136_v13 }
  0x2f   :  { %v126_v18 = vsub.f32 %v124_v12, %v125_v15  ;;  %p808_p6 = pnand %p807_p5, %p801_p2 }
  0x30   :  { %v138_v19 = vand.u32 4294901760, %v137_v16  ;;  %v145_v20 = vand.u32 4294901760, %v144_v17 }
  0x31   :  { %v127_v21 = vand.u32 4294901760, %v126_v18 }
  0x32   :  { %v723_v22 = vpack.c.bf16 %v145_v20, %v138_v19 }
  0x33   :  { %670 = vmatmul.mubr.f32.vlgmr.msra.gmra.mrb[0].mxu1 %v127_v21 }
  0x34   :  { %724 = vmatpush3.bf16.msra.mxu0 %v723_v22  ;;  %709 = vmatprep.mubr.msk.bf16.mxu1 %vm833_vm0, %v834_v1 }
  0x35   :  { %725 = vmatprep.subr.bf16.mxu0 %v832_v0 }
  0x37   :  { %677 = vmatmul.mubr.f32.vlgmr.msra.gmra.mrb[0].mxu0 %v123_v8 }
  0x38   :  { %727 = vmatpush3.bf16.msra.mxu0 %v726_v23  ;;  %683 = vmatprep.mubr.msk.f32.mxu0 %vm833_vm0, %v834_v1 }
  0x39   :  { %728 = vmatprep.subr.bf16.mxu0 %v832_v0 }
  0x3f   :  { %684 = vmatmul.mubr.f32.vlgmr.msra.gmra.mrb[0].mxu0 %v124_v12 }
  0x40   :  { %730 = vmatpush3.bf16.msra.mxu0 %v720_v11  ;;  %690 = vmatprep.mubr.msk.f32.mxu0 %vm833_vm0, %v834_v1 }
  0x41   :  { %731 = vmatprep.subr.bf16.mxu0 %v832_v0 }
  0x47   :  { %691 = vmatmul.mubr.f32.vlgmr.msra.gmra.mrb[0].mxu0 %v125_v15 }
  0x48   :  { %733 = vmatpush3.bf16.msra.mxu0 %v732_v24  ;;  %697 = vmatprep.mubr.msk.f32.mxu0 %vm833_vm0, %v834_v1 }
  0x49   :  { %734 = vmatprep.subr.bf16.mxu0 %v832_v0 }
  0x4f   :  { %698 = vmatmul.mubr.f32.vlgmr.msra.gmra.mrb[0].mxu0 %v123_v8 }
  0x50   :  { %736 = vmatpush3.bf16.msra.mxu0 %v720_v11  ;;  %704 = vmatprep.mubr.msk.f32.mxu0 %vm833_vm0, %v834_v1 }
  0x57   :  { %705 = vmatmul.mubr.f32.vlgmr.msra.gmra.mrb[0].mxu0 %v123_v8 }
 0x106   :  { %v129_v25 = vpop.f32.mrb[0].mxu1 }
 0x107   :  { %v671_v26 = vpop.f32.mrb[1].mxu1 }
 0x12a   :  { %v511_v27 = vpop.f32.mrb[0].mxu0 }
 0x12b   :  { %v737_v28 = vadd.f32 %v511_v27, %v129_v25  ;;  %v706_v29 = vpop.f32.mrb[1].mxu0 }
 0x12d   :  { %754 = vtanh.f32 %v737_v28 }
 0x137   :  { %v755_v30 = vpop.eup %754 }
 0x138   :  { %v517_v31 = vpack.c.bf16 %v755_v30, %v755_v30 }
 0x13a   :  { %518 = vst [vmem:[#allocation3] sm:$0xf] %v517_v31 }
 0x141   :  { %v519_v32 = vld [vmem:[#allocation3] sm:$0xf] }
 0x142   :  { %v527_v33 = vsel %vm525_vm2, %v519_v32, 0 }
 0x143   :  { %708 = vmatpush3.bf16.msra.mxu1 %v527_v33 }
 0x144   :  { %713 = vmatprep.subr.bf16.mxu1 %v834_v1 }
 0x146   :  { %710 = vmatmul.mubr.msk.bf16.vlgmr.msra.gmra.mrb[4].mxu1 %vm521_vm3, %v520_v34 }
 0x147   :  { %714 = vmatpush3.bf16.msra.mxu1 %v527_v33  ;;  %715 = vmatprep.mubr.msk.bf16.mxu1 %vm833_vm0, %v834_v1 }
 0x14e   :  { %716 = vmatmul.mubr.msk.bf16.vlgmr.msra.gmra.mrb[8].mxu1 %vm521_vm3, %v569_v35 }
 0x219   :  { %v563_v36 = vpop.f32.mrb[4].mxu1 }
 0x21a   :  { %v711_v37 = vpop.f32.mrb[5].mxu1  ;;  %v614_v40 = vmul.f32 %v563_v36, %v563_v36  ;;  %vm613_vm4 = vcmp.ge.f32.partialorder %v563_v36, 0.0 }
 0x21b   :  { %v566_v38 = vpop.f32.mrb[6].mxu1 }
 0x21c   :  { %v712_v39 = vpop.f32.mrb[7].mxu1  ;;  %v615_v45 = vmul.f32 0.9847995, %v614_v40 }
 0x221   :  { %v607_v41 = vpop.f32.mrb[8].mxu1 }
 0x222   :  { %v616_v42 = vmul.f32 %v607_v41, %v607_v41  ;;  %v717_v43 = vpop.f32.mrb[9].mxu1 }
 0x223   :  { %v610_v44 = vpop.f32.mrb[10].mxu1 }
 0x224   :  { %v617_v46 = vmul.f32 0.015200523, %v616_v42  ;;  %v718_v47 = vpop.f32.mrb[11].mxu1 }
 0x226   :  { %vm618_vm5 = vcmp.lt.f32.partialorder %v615_v45, %v617_v46 }
 0x227   :  { %vm619_vm6 = vmor %vm613_vm4, %vm618_vm5 }
 0x228   :  { %v623_v48 = vsel %vm619_vm6, %v755_v30, 0.0 }
 0x229   :  { %624 = vst [vmem:[#allocation9] sm:$0xff] %v623_v48 }
 0x22a   :  { %811 = shalt.err (!%p808_p6)
}
 0x22b   :  { %s812_s20 = scalar_lea.hbm %s932_s4, 128 }
 0x22c   :  { %p813_p7 = scmp.ne.s32.totalorder %s932_s4, %s812_s20  ;;  %p816_p8 = scmp.lt.u32.totalorder %s812_s20, %s932_s4 }
 0x22e   :  { %p818_p9 = pnand %p816_p8, %p813_p7 }
 0x230   :  { %821 = shalt.err (!%p818_p9)
}
 0x231   :  { %634 = dma.vmem_to_hbm [thread:$0]  %s632_s17, 128, %s932_s4, [#allocation6]  }
 0x232   :  { %826 = dma.done.wait [#allocation6], 128  }
 0x233   :  { %827 = vsyncadd [#allocation6], 4294967168 }
 0x234   :  { %638 = vsyncpa [#allocation5], 1 }
 0x235   :  { %639 = vsyncpa [#allocation8], 1 }
 0x236   :  { %640 = vsyncpa [#allocation6], 1 }

</bundles_post_ra>
